<compile_context>
chip_gen: v5e
topology: v5e:2x2
jax: 0.10.0
libtpu: 0.0.40
codegen_flags: <defaults>
</compile_context>

<pallas_src>
import functools

import jax
import jax.numpy as jnp
from jax.experimental import pallas as pl
from jax.experimental.pallas import tpu as pltpu

HIDDEN = 128
OUT_PAD = 128            # fc3 padded to a full 128-lane output block (lane-dense vst)
_NEG_BIG = -1.0e30       # finite pad bias; exp(_NEG_BIG - m) underflows to exactly 0.0


def policy_kernel(x_ref, w1_ref, b1_ref, w2_ref, b2_ref, w3_ref, b3_ref, o_ref):
    # MXU operand dtype follows the (pre-converted) weight dtype (f32 or bf16);
    # accumulation and all VPU/EUP math (ReLU, exp, max, sum, reciprocal) stay f32.
    mxu_dtype = w1_ref.dtype
    x = x_ref[...].astype(mxu_dtype)

    # fc1 + relu
    h1 = jnp.dot(x, w1_ref[...], preferred_element_type=jnp.float32) + b1_ref[...]
    h1 = jnp.maximum(h1, 0.0)

    # fc2 + relu
    h2 = jnp.dot(h1.astype(mxu_dtype), w2_ref[...],
                 preferred_element_type=jnp.float32) + b2_ref[...]
    h2 = jnp.maximum(h2, 0.0)

    # fc3 (padded to 128 cols) + softmax(dim=-1).  Pad columns carry bias -1e30, so
    # exp(pad - m) == 0 and the softmax over the real columns is unchanged.
    logits = jnp.dot(h2.astype(mxu_dtype), w3_ref[...],
                     preferred_element_type=jnp.float32) + b3_ref[...]
    m = jnp.max(logits, axis=-1, keepdims=True)
    e = jnp.exp(logits - m)
    # approx=False keeps the 1e-5 sum-to-1 guarantee; approx=True uses the EUP vrcp.
    probs = e * pl.reciprocal(jnp.sum(e, axis=-1, keepdims=True), approx=False)

    o_ref[...] = probs.astype(o_ref.dtype)


def _cdiv(a, b):
    return (a + b - 1) // b


def _round_up(n, m):
    return ((n + m - 1) // m) * m


def _choose_tiling(B, block_batch, min_grid_steps):
    """Pick the tile from the batch (not the batch from the tile).

    min_grid_steps=2 on v7x guarantees the 'parallel' batch axis actually shards
    across both TensorCores; on single-TC v5e/v6e leave it at 1 (one big step).
    """
    n_steps = max(min_grid_steps, _cdiv(B, block_batch))
    if n_steps > 1 and n_steps % 2:
        n_steps += 1                      # even step count splits cleanly over 2 TCs
    tb = _round_up(_cdiv(B, n_steps), 8)  # sublane-aligned; padding < 8 rows/step
    return tb, tb * n_steps, n_steps


def convert_params_for_kernel(params, dtype=jnp.float32):
    """One-time layout conversion (do this at init, NOT per forward call).

    PyTorch layout: w* are (out, in), b* are (out,).
    Kernel layout:  w* are (in, out) so the kernel does plain x @ W; b* are (1, out).
    fc3 is padded to OUT_PAD=128 columns (zero weight columns, -1e30 bias) so the
    kernel's output block is lane-dense.  Pass dtype=jnp.bfloat16 for large-batch
    throughput on v6e/v7x (f32 accumulate); biases stay f32.
    """
    out_size = params["w3"].shape[0]
    pad = OUT_PAD - out_size
    w3 = params["w3"].T.astype(dtype)                  # (HIDDEN, out_size)
    b3 = params["b3"].astype(jnp.float32)              # (out_size,)
    if pad > 0:
        w3 = jnp.pad(w3, ((0, 0), (0, pad)))
        b3 = jnp.pad(b3, (0, pad), constant_values=_NEG_BIG)
    return {
        "w1": params["w1"].T.astype(dtype),
        "w2": params["w2"].T.astype(dtype),
        "w3": w3,
        "b1": params["b1"][None, :].astype(jnp.float32),
        "b2": params["b2"][None, :].astype(jnp.float32),
        "b3": b3[None, :],
    }


@functools.partial(jax.jit,
                   static_argnames=("out_size", "block_batch", "min_grid_steps"))
def policy_forward(x, kparams, *, out_size, block_batch=4096, min_grid_steps=1):
    """x: (B, input_size) f32; kparams: output of convert_params_for_kernel."""
    B, in_size = x.shape
    tb, padded_B, n_steps = _choose_tiling(B, block_batch, min_grid_steps)
    if padded_B != B:
        x = jnp.pad(x, ((0, padded_B - B), (0, 0)))

    # Weights/biases: same (full-array) block every grid step -> VMEM-resident.
    def resident(arr):
        return pl.BlockSpec(arr.shape, lambda i, _n=arr.ndim: (0,) * _n)

    itemsize = jnp.dtype(kparams["w1"].dtype).itemsize
    weight_elems = in_size * HIDDEN + HIDDEN * HIDDEN + HIDDEN * OUT_PAD
    flops = 2 * padded_B * weight_elems
    bytes_accessed = (
        padded_B * in_size * 4
        + weight_elems * itemsize
        + (HIDDEN + HIDDEN + OUT_PAD) * 4
        + padded_B * OUT_PAD * 4
    )

    # VMEM budget: x + out double-buffered, h1/h2 staging, resident weights; cap
    # comfortably under physical VMEM on every chip (v7x has only 64 MiB/TC).
    per_step_bytes = 2 * tb * in_size * 4 + 2 * tb * OUT_PAD * 4 + 2 * tb * HIDDEN * 4
    weight_bytes = weight_elems * itemsize + 3 * OUT_PAD * 4
    vmem_limit = int(min(max(32 << 20, 2 * (per_step_bytes + weight_bytes)), 48 << 20))

    out = pl.pallas_call(
        policy_kernel,
        out_shape=jax.ShapeDtypeStruct((padded_B, OUT_PAD), jnp.float32),
        grid=(n_steps,),
        in_specs=[
            pl.BlockSpec((tb, in_size), lambda i: (i, 0)),
            resident(kparams["w1"]), resident(kparams["b1"]),
            resident(kparams["w2"]), resident(kparams["b2"]),
            resident(kparams["w3"]), resident(kparams["b3"]),
        ],
        out_specs=pl.BlockSpec((tb, OUT_PAD), lambda i: (i, 0)),
        compiler_params=pltpu.CompilerParams(
            dimension_semantics=("parallel",),      # shards steps across v7x's 2 TCs
            vmem_limit_bytes=vmem_limit),
        cost_estimate=pl.CostEstimate(
            flops=flops,
            transcendentals=padded_B * OUT_PAD,
            bytes_accessed=bytes_accessed),
    )(x, kparams["w1"], kparams["b1"], kparams["w2"], kparams["b2"],
      kparams["w3"], kparams["b3"])

    return out[:B, :out_size]


def init_params(key, input_size, output_size, hidden=HIDDEN):
    """Deterministic PyTorch-style init: U(-1/sqrt(fan_in), 1/sqrt(fan_in))."""
    ks = jax.random.split(key, 6)

    def lin(kw, kb, fan_in, fan_out):
        bound = 1.0 / jnp.sqrt(fan_in)
        w = jax.random.uniform(kw, (fan_out, fan_in), jnp.float32, -bound, bound)
        b = jax.random.uniform(kb, (fan_out,), jnp.float32, -bound, bound)
        return w, b

    w1, b1 = lin(ks[0], ks[1], input_size, hidden)
    w2, b2 = lin(ks[2], ks[3], hidden, hidden)
    w3, b3 = lin(ks[4], ks[5], hidden, output_size)
    return {"w1": w1, "b1": b1, "w2": w2, "b2": b2, "w3": w3, "b3": b3}


if __name__ == "__main__":
    key = jax.random.PRNGKey(0)
    k_in, k_in2, k_params = jax.random.split(key, 3)

    # LunarLander-v2: observation dim 8, action dim 4.
    input_size, output_size = 8, 4
    params = init_params(k_params, input_size, output_size)
    kparams = convert_params_for_kernel(params)          # one-time layout hoist

    # Pure-JAX reference on the original (PyTorch-layout) params.
    def ref(x, p):
        h = jnp.maximum(x @ p["w1"].T + p["b1"], 0.0)
        h = jnp.maximum(h @ p["w2"].T + p["b2"], 0.0)
        return jax.nn.softmax(h @ p["w3"].T + p["b3"], axis=-1)

    # Single big tile (default min_grid_steps=1, i.e. v5e/v6e-style one step).
    x_a = jax.random.normal(k_in, (64, input_size), dtype=jnp.float32)
    probs_a = jax.block_until_ready(
        policy_forward(x_a, kparams, out_size=output_size))
    assert probs_a.shape == (64, output_size)
    assert jnp.allclose(probs_a, ref(x_a, params), atol=1e-5, rtol=1e-5)
    assert jnp.allclose(jnp.sum(probs_a, axis=-1), 1.0, atol=1e-5)

    # Ragged batch with min_grid_steps=2 (v7x dual-TensorCore path + pad/slice).
    x_b = jax.random.normal(k_in2, (37, input_size), dtype=jnp.float32)
    probs_b = jax.block_until_ready(
        policy_forward(x_b, kparams, out_size=output_size, min_grid_steps=2))
    assert probs_b.shape == (37, output_size)
    assert jnp.allclose(probs_b, ref(x_b, params), atol=1e-5, rtol=1e-5)
    assert jnp.allclose(jnp.sum(probs_b, axis=-1), 1.0, atol=1e-5)

    print("KERNEL_OK")
</pallas_src>

<mosaic_0001>
module attributes {stable_mosaic.version = 11 : i64} {
  func.func @policy_kernel(%arg0: i32, %arg1: memref<64x8xf32, #tpu.memory_space<vmem>>, %arg2: memref<8x128xf32, #tpu.memory_space<vmem>>, %arg3: memref<1x128xf32, #tpu.memory_space<vmem>>, %arg4: memref<128x128xf32, #tpu.memory_space<vmem>>, %arg5: memref<1x128xf32, #tpu.memory_space<vmem>>, %arg6: memref<128x128xf32, #tpu.memory_space<vmem>>, %arg7: memref<1x128xf32, #tpu.memory_space<vmem>>, %arg8: memref<64x128xf32, #tpu.memory_space<vmem>>) attributes {dimension_semantics = [#tpu.dimension_semantics<parallel>], iteration_bounds = array<i64: 1>, scalar_prefetch = 0 : i64, scratch_operands = 0 : i64, tpu.core_type = #tpu.core_type<tc>, window_params = [{transform_indices = @transform_0, window_bounds = array<i64: 64, 8>}, {pipeline_mode = #tpu.pipeline_mode<synchronous>, transform_indices = @transform_1, window_bounds = array<i64: 8, 128>}, {pipeline_mode = #tpu.pipeline_mode<synchronous>, transform_indices = @transform_2, window_bounds = array<i64: 1, 128>}, {pipeline_mode = #tpu.pipeline_mode<synchronous>, transform_indices = @transform_3, window_bounds = array<i64: 128, 128>}, {pipeline_mode = #tpu.pipeline_mode<synchronous>, transform_indices = @transform_4, window_bounds = array<i64: 1, 128>}, {pipeline_mode = #tpu.pipeline_mode<synchronous>, transform_indices = @transform_5, window_bounds = array<i64: 128, 128>}, {pipeline_mode = #tpu.pipeline_mode<synchronous>, transform_indices = @transform_6, window_bounds = array<i64: 1, 128>}, {transform_indices = @transform_7, window_bounds = array<i64: 64, 128>}]} {
    %c0 = arith.constant 0 : index
    %c0_0 = arith.constant 0 : index
    %0 = vector.load %arg1[%c0, %c0_0] : memref<64x8xf32, #tpu.memory_space<vmem>>, vector<64x8xf32>
    %c0_1 = arith.constant 0 : index
    %c0_2 = arith.constant 0 : index
    %1 = vector.load %arg2[%c0_1, %c0_2] : memref<8x128xf32, #tpu.memory_space<vmem>>, vector<8x128xf32>
    %cst = arith.constant dense<0.000000e+00> : vector<64x128xf32>
    %2 = tpu.matmul %0, %1, %cst {dimension_numbers = #tpu.dot_dimension_numbers<[1], [0], [0], [1], [0, 0, 1, 1], [], []>} : vector<64x8xf32>, vector<8x128xf32>, vector<64x128xf32> -> vector<64x128xf32>
    %c0_3 = arith.constant 0 : index
    %c0_4 = arith.constant 0 : index
    %3 = vector.load %arg3[%c0_3, %c0_4] : memref<1x128xf32, #tpu.memory_space<vmem>>, vector<1x128xf32>
    %4 = vector.broadcast %3 : vector<1x128xf32> to vector<64x128xf32>
    %5 = arith.addf %2, %4 : vector<64x128xf32>
    %cst_5 = arith.constant 0.000000e+00 : f32
    %6 = vector.broadcast %cst_5 : f32 to vector<64x128xf32>
    %7 = arith.maximumf %5, %6 : vector<64x128xf32>
    %c0_6 = arith.constant 0 : index
    %c0_7 = arith.constant 0 : index
    %8 = vector.load %arg4[%c0_6, %c0_7] : memref<128x128xf32, #tpu.memory_space<vmem>>, vector<128x128xf32>
    %cst_8 = arith.constant dense<0.000000e+00> : vector<64x128xf32>
    %9 = tpu.matmul %7, %8, %cst_8 {dimension_numbers = #tpu.dot_dimension_numbers<[1], [0], [0], [1], [0, 0, 1, 1], [], []>} : vector<64x128xf32>, vector<128x128xf32>, vector<64x128xf32> -> vector<64x128xf32>
    %c0_9 = arith.constant 0 : index
    %c0_10 = arith.constant 0 : index
    %10 = vector.load %arg5[%c0_9, %c0_10] : memref<1x128xf32, #tpu.memory_space<vmem>>, vector<1x128xf32>
    %11 = vector.broadcast %10 : vector<1x128xf32> to vector<64x128xf32>
    %12 = arith.addf %9, %11 : vector<64x128xf32>
    %cst_11 = arith.constant 0.000000e+00 : f32
    %13 = vector.broadcast %cst_11 : f32 to vector<64x128xf32>
    %14 = arith.maximumf %12, %13 : vector<64x128xf32>
    %c0_12 = arith.constant 0 : index
    %c0_13 = arith.constant 0 : index
    %15 = vector.load %arg6[%c0_12, %c0_13] : memref<128x128xf32, #tpu.memory_space<vmem>>, vector<128x128xf32>
    %cst_14 = arith.constant dense<0.000000e+00> : vector<64x128xf32>
    %16 = tpu.matmul %14, %15, %cst_14 {dimension_numbers = #tpu.dot_dimension_numbers<[1], [0], [0], [1], [0, 0, 1, 1], [], []>} : vector<64x128xf32>, vector<128x128xf32>, vector<64x128xf32> -> vector<64x128xf32>
    %c0_15 = arith.constant 0 : index
    %c0_16 = arith.constant 0 : index
    %17 = vector.load %arg7[%c0_15, %c0_16] : memref<1x128xf32, #tpu.memory_space<vmem>>, vector<1x128xf32>
    %18 = vector.broadcast %17 : vector<1x128xf32> to vector<64x128xf32>
    %19 = arith.addf %16, %18 : vector<64x128xf32>
    %cst_17 = arith.constant dense<0xFF800000> : vector<64xf32>
    %20 = vector.multi_reduction <maximumf>, %19, %cst_17 [1] : vector<64x128xf32> to vector<64xf32>
    %21 = vector.shape_cast %20 : vector<64xf32> to vector<64x1xf32>
    %22 = vector.broadcast %21 : vector<64x1xf32> to vector<64x128xf32>
    %23 = arith.subf %19, %22 : vector<64x128xf32>
    %24 = math.exp %23 : vector<64x128xf32>
    %cst_18 = arith.constant dense<0.000000e+00> : vector<64xf32>
    %25 = vector.multi_reduction <add>, %24, %cst_18 [1] : vector<64x128xf32> to vector<64xf32>
    %26 = vector.shape_cast %25 : vector<64xf32> to vector<64x1xf32>
    %27 = tpu.reciprocal %26 : vector<64x1xf32> -> vector<64x1xf32>
    %28 = vector.broadcast %27 : vector<64x1xf32> to vector<64x128xf32>
    %29 = arith.mulf %24, %28 : vector<64x128xf32>
    %c0_19 = arith.constant 0 : index
    %c0_20 = arith.constant 0 : index
    %30 = vector.load %arg8[%c0_19, %c0_20] : memref<64x128xf32, #tpu.memory_space<vmem>>, vector<64x128xf32>
    tpu.vector_store %arg8[%c0_19, %c0_20], %29 {strides = array<i32>} : memref<64x128xf32, #tpu.memory_space<vmem>>, vector<64x128xf32>,
    return
  }
  func.func @transform_0(%arg0: i32) -> (i32, i32) {
    %c0_i32 = arith.constant 0 : i32
    %c0_i32_0 = arith.constant 0 : i32
    return %arg0, %c0_i32 : i32, i32
  }
  func.func @transform_1(%arg0: i32) -> (i32, i32) {
    %c0_i32 = arith.constant 0 : i32
    %c0_i32_0 = arith.constant 0 : i32
    %c0_i32_1 = arith.constant 0 : i32
    return %c0_i32, %c0_i32_0 : i32, i32
  }
  func.func @transform_2(%arg0: i32) -> (i32, i32) {
    %c0_i32 = arith.constant 0 : i32
    %c0_i32_0 = arith.constant 0 : i32
    %c0_i32_1 = arith.constant 0 : i32
    return %c0_i32, %c0_i32_0 : i32, i32
  }
  func.func @transform_3(%arg0: i32) -> (i32, i32) {
    %c0_i32 = arith.constant 0 : i32
    %c0_i32_0 = arith.constant 0 : i32
    %c0_i32_1 = arith.constant 0 : i32
    return %c0_i32, %c0_i32_0 : i32, i32
  }
  func.func @transform_4(%arg0: i32) -> (i32, i32) {
    %c0_i32 = arith.constant 0 : i32
    %c0_i32_0 = arith.constant 0 : i32
    %c0_i32_1 = arith.constant 0 : i32
    return %c0_i32, %c0_i32_0 : i32, i32
  }
  func.func @transform_5(%arg0: i32) -> (i32, i32) {
    %c0_i32 = arith.constant 0 : i32
    %c0_i32_0 = arith.constant 0 : i32
    %c0_i32_1 = arith.constant 0 : i32
    return %c0_i32, %c0_i32_0 : i32, i32
  }
  func.func @transform_6(%arg0: i32) -> (i32, i32) {
    %c0_i32 = arith.constant 0 : i32
    %c0_i32_0 = arith.constant 0 : i32
    %c0_i32_1 = arith.constant 0 : i32
    return %c0_i32, %c0_i32_0 : i32, i32
  }
  func.func @transform_7(%arg0: i32) -> (i32, i32) {
    %c0_i32 = arith.constant 0 : i32
    %c0_i32_0 = arith.constant 0 : i32
    return %arg0, %c0_i32 : i32, i32
  }
}

</mosaic_0001>

<bundles_post_ra>
// kernel: policy_forward.1
= control target key start
LH: loop header
LB: loop body
LE: loop exit
PB: predicated region body
PF: predicated region fallthrough
CT: control target
= control target key end

     0   :  { %12 = vsyncpa [#allocation3], 0  ;;  %s756_s0 = inlined_call_operand.vmem [shape: f32[64,8], index: 0, kind: input, shape index: {}]   ;;  %s757_s1 = inlined_call_operand.vmem [shape: f32[8,128], index: 1, kind: input, shape index: {}]   ;;  %s758_s2 = inlined_call_operand.vmem [shape: f32[1,128], index: 2, kind: input, shape index: {}]   ;;  %s759_s3 = inlined_call_operand.hbm [shape: f32[128,128], index: 3, kind: input, shape index: {}]   ;;  %s760_s4 = inlined_call_operand.vmem [shape: f32[1,128], index: 4, kind: input, shape index: {}]   ;;  %s761_s5 = inlined_call_operand.hbm [shape: f32[128,128], index: 5, kind: input, shape index: {}]   ;;  %s762_s6 = inlined_call_operand.vmem [shape: f32[1,128], index: 6, kind: input, shape index: {}]   ;;  %s763_s7 = inlined_call_operand.vmem [shape: f32[64,128], index: 7, kind: output, shape index: {}]  }
   0x1   :  { %s24_s26 = sshll.u32 %s759_s3, 4  ;;  %s25_s26 = int_to_ptr.hbm [resolvable:$true] %s24_s26 }
   0x2   :  { %13 = vsyncpa [#allocation5], 0  ;;  %s596_s27 = smov [#allocation2]   ;;  %s39_s8 = sshll.u32 %s761_s5, 4  ;;  %s40_s8 = int_to_ptr.hbm [resolvable:$true] %s39_s8 }
   0x3   :  { %s26_s28 = sshll.u32 %s596_s27, 4  ;;  %s597_s9 = smov 128   ;;  %s27_s28 = int_to_ptr.vmem [resolvable:$true] %s26_s28 }
   0x4   :  { %s598_s10 = smov 8   ;;  %s599_s11 = smov [#allocation4]  }
   0x5   :  { %32 = dma.hbm_to_vmem [thread:$0]  %s25_s26, 2048, %s27_s28, [#allocation3], %s597_s9, %s597_s9, %s598_s10  }
   0x6   :  { %s41_s12 = sshll.u32 %s599_s11, 4  ;;  %s42_s12 = int_to_ptr.vmem [resolvable:$true] %s41_s12 }
   0x7   :  { %47 = dma.hbm_to_vmem [thread:$0]  %s40_s8, 2048, %s42_s12, [#allocation5], %s597_s9, %s597_s9, %s598_s10  }
   0x8   :  { %592 = dma.done.wait [#allocation3], 2048  }
   0x9   :  { %593 = vsyncadd [#allocation3], 4294965248 }
   0xa   :  { %594 = dma.done.wait [#allocation5], 2048  }
   0xb   :  { %595 = vsyncadd [#allocation5], 4294965248  ;;  %vm71_vm0 = vcmask 64512   ;;  %v66_v0 = vld [vmem:[%s757_s1] sm:$0xff]  ;;  %v59_v2 = vld [vmem:[%s756_s0 + $0x8] sm:$0xff] }
   0xc   :  { %v58_v1 = vld [vmem:[%s756_s0] sm:$0xff]  ;;  %111 = vmatpush.msra.mxu0 %v66_v0  ;;  %v60_v3 = vld [vmem:[%s756_s0 + $0x10] sm:$0xff]  ;;  %v61_v4 = vld [vmem:[%s756_s0 + $0x18] sm:$0xff] }
   0xd   :  { %465 = vmatmul.msk.f32.vlgmr.msra.gmra.mxu0 %vm71_vm0, %v58_v1  ;;  %v160_v5 = vld [vmem:[#allocation2 + $0x78] sm:$0xff]  ;;  %v159_v6 = vld [vmem:[#allocation2 + $0x70] sm:$0xff]  ;;  %v158_v7 = vld [vmem:[#allocation2 + $0x68] sm:$0xff] }
   0xe   :  { %165 = vmatpush.msra.mxu1 %v160_v5  ;;  %473 = vmatpush.msra.mxu3 %v160_v5  ;;  %v157_v8 = vld [vmem:[#allocation2 + $0x60] sm:$0xff]  ;;  %v156_v10 = vld [vmem:[#allocation2 + $0x58] sm:$0xff]  ;;  %v155_v11 = vld [vmem:[#allocation2 + $0x50] sm:$0xff] }
   0xf   :  { %v62_v9 = vld [vmem:[%s756_s0 + $0x20] sm:$0xff]  ;;  %v154_v12 = vld [vmem:[#allocation2 + $0x48] sm:$0xff]  ;;  %v152_v15 = vld [vmem:[#allocation2 + $0x38] sm:$0xff] }
  0x10   :  { %166 = vmatpush.msra.mxu1 %v159_v6  ;;  %474 = vmatpush.msra.mxu3 %v159_v6  ;;  %v153_v13 = vld [vmem:[#allocation2 + $0x40] sm:$0xff]  ;;  %v63_v14 = vld [vmem:[%s756_s0 + $0x28] sm:$0xff]  ;;  %v151_v16 = vld [vmem:[#allocation2 + $0x30] sm:$0xff] }
  0x11   :  { %v150_v17 = vld [vmem:[#allocation2 + $0x28] sm:$0xff]  ;;  %v149_v18 = vld [vmem:[#allocation2 + $0x20] sm:$0xff]  ;;  %v64_v19 = vld [vmem:[%s756_s0 + $0x30] sm:$0xff] }
  0x12   :  { %167 = vmatpush.msra.mxu1 %v158_v7  ;;  %475 = vmatpush.msra.mxu3 %v158_v7  ;;  %v148_v20 = vld [vmem:[#allocation2 + $0x18] sm:$0xff]  ;;  %v147_v22 = vld [vmem:[#allocation2 + $0x10] sm:$0xff]  ;;  %v146_v23 = vld [vmem:[#allocation2 + $0x8] sm:$0xff] }
  0x13   :  { %v65_v21 = vld [vmem:[%s756_s0 + $0x38] sm:$0xff]  ;;  %v145_v24 = vld [vmem:[#allocation2] sm:$0xff]  ;;  %v228_v39 = vld [vmem:[#allocation4 + $0x70] sm:$0xff] }
  0x14   :  { %168 = vmatpush.msra.mxu1 %v157_v8  ;;  %476 = vmatpush.msra.mxu3 %v157_v8  ;;  %v684_v25 = vld [vmem:[%s758_s2] ss:$0 sm:$0xff]  ;;  %v229_v38 = vld [vmem:[#allocation4 + $0x78] sm:$0xff]  ;;  %v227_v40 = vld [vmem:[#allocation4 + $0x68] sm:$0xff] }
  0x15   :  { %466 = vmatmul.msk.f32.gmra.mxu0 %vm71_vm0, %v59_v2  ;;  %234 = vmatpush.msra.mxu2 %v229_v38  ;;  %v226_v43 = vld [vmem:[#allocation4 + $0x60] sm:$0xff]  ;;  %v225_v45 = vld [vmem:[#allocation4 + $0x58] sm:$0xff]  ;;  %v224_v46 = vld [vmem:[#allocation4 + $0x50] sm:$0xff] }
  0x16   :  { %169 = vmatpush.msra.mxu1 %v156_v10  ;;  %477 = vmatpush.msra.mxu3 %v156_v10  ;;  %v223_v47 = vld [vmem:[#allocation4 + $0x48] sm:$0xff]  ;;  %v222_v50 = vld [vmem:[#allocation4 + $0x40] sm:$0xff]  ;;  %v221_v52 = vld [vmem:[#allocation4 + $0x38] sm:$0xff] }
  0x17   :  { %235 = vmatpush.msra.mxu2 %v228_v39  ;;  %v220_v53 = vld [vmem:[#allocation4 + $0x30] sm:$0xff]  ;;  %v219_v54 = vld [vmem:[#allocation4 + $0x28] sm:$0xff]  ;;  %v218_v57 = vld [vmem:[#allocation4 + $0x20] sm:$0xff] }
  0x18   :  { %170 = vmatpush.msra.mxu1 %v155_v11  ;;  %478 = vmatpush.msra.mxu3 %v155_v11  ;;  %v217_v59 = vld [vmem:[#allocation4 + $0x18] sm:$0xff]  ;;  %v216_v63 = vld [vmem:[#allocation4 + $0x10] sm:$0xff]  ;;  %v215_v0 = vld [vmem:[#allocation4 + $0x8] sm:$0xff] }
  0x19   :  { %236 = vmatpush.msra.mxu2 %v227_v40  ;;  %v214_v1 = vld [vmem:[#allocation4] sm:$0xff] }
  0x1a   :  { %171 = vmatpush.msra.mxu1 %v154_v12  ;;  %479 = vmatpush.msra.mxu3 %v154_v12  ;;  %v510_v2 = vld [vmem:[%s760_s4] ss:$0 sm:$0xff] }
  0x1b   :  { %237 = vmatpush.msra.mxu2 %v226_v43 }
  0x1c   :  { %172 = vmatpush.msra.mxu1 %v153_v13  ;;  %480 = vmatpush.msra.mxu3 %v153_v13 }
  0x1d   :  { %467 = vmatmul.msk.f32.gmra.mxu0 %vm71_vm0, %v60_v3  ;;  %238 = vmatpush.msra.mxu2 %v225_v45 }
  0x1e   :  { %173 = vmatpush.msra.mxu1 %v152_v15  ;;  %481 = vmatpush.msra.mxu3 %v152_v15 }
  0x1f   :  { %239 = vmatpush.msra.mxu2 %v224_v46 }
  0x20   :  { %174 = vmatpush.msra.mxu1 %v151_v16  ;;  %482 = vmatpush.msra.mxu3 %v151_v16 }
  0x21   :  { %240 = vmatpush.msra.mxu2 %v223_v47 }
  0x22   :  { %175 = vmatpush.msra.mxu1 %v150_v17  ;;  %483 = vmatpush.msra.mxu3 %v150_v17 }
  0x23   :  { %241 = vmatpush.msra.mxu2 %v222_v50 }
  0x24   :  { %176 = vmatpush.msra.mxu1 %v149_v18  ;;  %484 = vmatpush.msra.mxu3 %v149_v18 }
  0x25   :  { %468 = vmatmul.msk.f32.gmra.mxu0 %vm71_vm0, %v61_v4  ;;  %242 = vmatpush.msra.mxu2 %v221_v52 }
  0x26   :  { %177 = vmatpush.msra.mxu1 %v148_v20  ;;  %485 = vmatpush.msra.mxu3 %v148_v20 }
  0x27   :  { %243 = vmatpush.msra.mxu2 %v220_v53 }
  0x28   :  { %178 = vmatpush.msra.mxu1 %v147_v22  ;;  %486 = vmatpush.msra.mxu3 %v147_v22 }
  0x29   :  { %244 = vmatpush.msra.mxu2 %v219_v54 }
  0x2a   :  { %179 = vmatpush.msra.mxu1 %v146_v23  ;;  %487 = vmatpush.msra.mxu3 %v146_v23 }
  0x2b   :  { %245 = vmatpush.msra.mxu2 %v218_v57 }
  0x2c   :  { %180 = vmatpush.msra.mxu1 %v145_v24  ;;  %488 = vmatpush.msra.mxu3 %v145_v24 }
  0x2d   :  { %469 = vmatmul.msk.f32.gmra.mxu0 %vm71_vm0, %v62_v9  ;;  %246 = vmatpush.msra.mxu2 %v217_v59 }
  0x2e   :  { %489 = vmatpush.msrb.mxu3 %v229_v38 }
  0x2f   :  { %247 = vmatpush.msra.mxu2 %v216_v63 }
  0x30   :  { %490 = vmatpush.msrb.mxu3 %v228_v39 }
  0x31   :  { %248 = vmatpush.msra.mxu2 %v215_v0 }
  0x32   :  { %491 = vmatpush.msrb.mxu3 %v227_v40 }
  0x33   :  { %249 = vmatpush.msra.mxu2 %v214_v1 }
  0x34   :  { %492 = vmatpush.msrb.mxu3 %v226_v43 }
  0x35   :  { %470 = vmatmul.msk.f32.gmra.mxu0 %vm71_vm0, %v63_v14 }
  0x36   :  { %493 = vmatpush.msrb.mxu3 %v225_v45 }
  0x38   :  { %494 = vmatpush.msrb.mxu3 %v224_v46 }
  0x3a   :  { %495 = vmatpush.msrb.mxu3 %v223_v47 }
  0x3c   :  { %496 = vmatpush.msrb.mxu3 %v222_v50 }
  0x3d   :  { %471 = vmatmul.msk.f32.gmra.mxu0 %vm71_vm0, %v64_v19 }
  0x3e   :  { %497 = vmatpush.msrb.mxu3 %v221_v52 }
  0x40   :  { %498 = vmatpush.msrb.mxu3 %v220_v53 }
  0x42   :  { %499 = vmatpush.msrb.mxu3 %v219_v54 }
  0x44   :  { %500 = vmatpush.msrb.mxu3 %v218_v57 }
  0x45   :  { %472 = vmatmul.msk.f32.gmra.mxu0 %vm71_vm0, %v65_v21 }
  0x46   :  { %501 = vmatpush.msrb.mxu3 %v217_v59 }
  0x48   :  { %502 = vmatpush.msrb.mxu3 %v216_v63 }
  0x4a   :  { %503 = vmatpush.msrb.mxu3 %v215_v0 }
  0x4c   :  { %504 = vmatpush.msrb.mxu3 %v214_v1 }
  0x8a   :  { %v113_v26 = vpop.f32.mrf.mxu0 }
  0x8b   :  { %v114_v27 = vadd.f32 %v684_v25, %v113_v26 }
  0x8d   :  { %v137_v28 = vmax.f32 %v114_v27, 0.0  ;;  %v511_v27 = vld [vmem:[%s762_s6] ss:$0 sm:$0xff] }
  0x8f   :  { %181 = vmatmul.f32.vlgmr.msra.gmra.mxu1 %v137_v28 }
  0x92   :  { %v116_v29 = vpop.f32.mrf.mxu0 }
  0x93   :  { %v117_v30 = vadd.f32 %v684_v25, %v116_v29 }
  0x95   :  { %v138_v31 = vmax.f32 %v117_v30, 0.0 }
  0x97   :  { %184 = vmatmul.f32.gmra.mxu1 %v138_v31 }
  0x9a   :  { %v119_v32 = vpop.f32.mrf.mxu0 }
  0x9b   :  { %v120_v33 = vadd.f32 %v684_v25, %v119_v32 }
  0x9d   :  { %v139_v34 = vmax.f32 %v120_v33, 0.0 }
  0x9f   :  { %187 = vmatmul.f32.gmra.mxu1 %v139_v34 }
  0xa2   :  { %v122_v35 = vpop.f32.mrf.mxu0 }
  0xa3   :  { %v123_v36 = vadd.f32 %v684_v25, %v122_v35 }
  0xa5   :  { %v140_v37 = vmax.f32 %v123_v36, 0.0 }
  0xa7   :  { %190 = vmatmul.f32.gmra.mxu1 %v140_v37 }
  0xaa   :  { %v125_v41 = vpop.f32.mrf.mxu0 }
  0xab   :  { %v126_v42 = vadd.f32 %v684_v25, %v125_v41 }
  0xad   :  { %v141_v44 = vmax.f32 %v126_v42, 0.0 }
  0xaf   :  { %193 = vmatmul.f32.gmra.mxu1 %v141_v44 }
  0xb2   :  { %v128_v48 = vpop.f32.mrf.mxu0 }
  0xb3   :  { %v129_v49 = vadd.f32 %v684_v25, %v128_v48 }
  0xb5   :  { %v142_v51 = vmax.f32 %v129_v49, 0.0 }
  0xb7   :  { %196 = vmatmul.f32.vlgmr.msra.gmra.mxu3 %v142_v51 }
  0xba   :  { %v131_v55 = vpop.f32.mrf.mxu0 }
  0xbb   :  { %v132_v56 = vadd.f32 %v684_v25, %v131_v55 }
  0xbd   :  { %v143_v58 = vmax.f32 %v132_v56, 0.0 }
  0xbf   :  { %199 = vmatmul.f32.gmra.mxu3 %v143_v58 }
  0xc2   :  { %v134_v60 = vpop.f32.mrf.mxu0 }
  0xc3   :  { %v135_v61 = vadd.f32 %v684_v25, %v134_v60 }
  0xc5   :  { %v144_v62 = vmax.f32 %v135_v61, 0.0 }
  0xc7   :  { %202 = vmatmul.f32.gmra.mxu3 %v144_v62 }
 0x10c   :  { %v182_v3 = vpop.f32.mrf.mxu1 }
 0x10d   :  { %v183_v4 = vadd.f32 %v510_v2, %v182_v3 }
 0x10f   :  { %v206_v5 = vmax.f32 %v183_v4, 0.0 }
 0x111   :  { %250 = vmatmul.f32.vlgmr.msra.gmra.mxu2 %v206_v5 }
 0x114   :  { %v185_v6 = vpop.f32.mrf.mxu1 }
 0x115   :  { %v186_v7 = vadd.f32 %v510_v2, %v185_v6 }
 0x117   :  { %v207_v8 = vmax.f32 %v186_v7, 0.0 }
 0x119   :  { %253 = vmatmul.f32.gmra.mxu2 %v207_v8 }
 0x11c   :  { %v188_v9 = vpop.f32.mrf.mxu1 }
 0x11d   :  { %v189_v10 = vadd.f32 %v510_v2, %v188_v9 }
 0x11f   :  { %v208_v11 = vmax.f32 %v189_v10, 0.0 }
 0x121   :  { %256 = vmatmul.f32.gmra.mxu2 %v208_v11 }
 0x124   :  { %v191_v12 = vpop.f32.mrf.mxu1 }
 0x125   :  { %v192_v13 = vadd.f32 %v510_v2, %v191_v12 }
 0x127   :  { %v209_v14 = vmax.f32 %v192_v13, 0.0 }
 0x129   :  { %259 = vmatmul.f32.gmra.mxu2 %v209_v14 }
 0x12c   :  { %v194_v15 = vpop.f32.mrf.mxu1 }
 0x12d   :  { %v195_v16 = vadd.f32 %v510_v2, %v194_v15 }
 0x12f   :  { %v210_v17 = vmax.f32 %v195_v16, 0.0 }
 0x131   :  { %262 = vmatmul.f32.gmra.mxu2 %v210_v17 }
 0x13a   :  { %v197_v18 = vpop.f32.mrf.mxu3 }
 0x13b   :  { %v198_v19 = vadd.f32 %v510_v2, %v197_v18 }
 0x13d   :  { %v211_v20 = vmax.f32 %v198_v19, 0.0 }
 0x13f   :  { %265 = vmatmul.f32.gmra.mxu2 %v211_v20 }
 0x142   :  { %v200_v21 = vpop.f32.mrf.mxu3 }
 0x143   :  { %v201_v22 = vadd.f32 %v510_v2, %v200_v21 }
 0x145   :  { %v212_v23 = vmax.f32 %v201_v22, 0.0 }
 0x147   :  { %268 = vmatmul.f32.vlgmr.msrb.gmra.mxu3 %v212_v23 }
 0x14a   :  { %v203_v24 = vpop.f32.mrf.mxu3 }
 0x14b   :  { %v204_v25 = vadd.f32 %v510_v2, %v203_v24 }
 0x14d   :  { %v213_v26 = vmax.f32 %v204_v25, 0.0 }
 0x14f   :  { %271 = vmatmul.f32.gmra.mxu3 %v213_v26 }
 0x194   :  { %v251_v28 = vpop.f32.mrf.mxu2 }
 0x195   :  { %v252_v29 = vadd.f32 %v511_v27, %v251_v28 }
 0x197   :  { %275 = vmax.xlane.f32.xlu0 %v252_v29 }
 0x19c   :  { %v254_v30 = vpop.f32.mrf.mxu2 }
 0x19d   :  { %v255_v31 = vadd.f32 %v511_v27, %v254_v30 }
 0x19f   :  { %277 = vmax.xlane.f32.xlu0 %v255_v31 }
 0x1a4   :  { %v257_v32 = vpop.f32.mrf.mxu2 }
 0x1a5   :  { %v258_v33 = vadd.f32 %v511_v27, %v257_v32 }
 0x1a7   :  { %279 = vmax.xlane.f32.xlu1 %v258_v33 }
 0x1ac   :  { %v260_v34 = vpop.f32.mrf.mxu2 }
 0x1ad   :  { %v261_v35 = vadd.f32 %v511_v27, %v260_v34 }
 0x1af   :  { %281 = vmax.xlane.f32.xlu1 %v261_v35 }
 0x1b4   :  { %v263_v36 = vpop.f32.mrf.mxu2 }
 0x1b5   :  { %v264_v37 = vadd.f32 %v511_v27, %v263_v36 }
 0x1b7   :  { %283 = vmax.xlane.f32.xlu2 %v264_v37 }
 0x1c2   :  { %v266_v38 = vpop.f32.mrf.mxu2 }
 0x1c3   :  { %v267_v39 = vadd.f32 %v511_v27, %v266_v38 }
 0x1c5   :  { %285 = vmax.xlane.f32.xlu2 %v267_v39 }
 0x1ca   :  { %v269_v40 = vpop.f32.mrf.mxu3 }
 0x1cb   :  { %v270_v41 = vadd.f32 %v511_v27, %v269_v40 }
 0x1cd   :  { %287 = vmax.xlane.f32.xlu0 %v270_v41 }
 0x1d2   :  { %v272_v42 = vpop.f32.mrf.mxu3 }
 0x1d3   :  { %v273_v43 = vadd.f32 %v511_v27, %v272_v42 }
 0x1d5   :  { %289 = vmax.xlane.f32.xlu1 %v273_v43 }
 0x20a   :  { %v276_v44 = vpop.xlane.xlu0 %275 }
 0x20b   :  { %v291_v45 = vsub.f32 %v252_v29, %v276_v44 }
 0x20d   :  { %v299_v46 = vmul.f32 1.442695, %v291_v45 }
 0x20f   :  { %512 = vpow2.f32 %v299_v46 }
 0x212   :  { %v278_v47 = vpop.xlane.xlu0 %277 }
 0x213   :  { %v292_v48 = vsub.f32 %v255_v31, %v278_v47 }
 0x215   :  { %v700_v49 = vpop.eup %512  ;;  %v301_v50 = vmul.f32 1.442695, %v292_v48 }
 0x216   :  { %315 = vadd.xlane.f32.xlu2 %v700_v49 }
 0x217   :  { %514 = vpow2.f32 %v301_v50 }
 0x21a   :  { %v280_v51 = vpop.xlane.xlu1 %279 }
 0x21b   :  { %v293_v52 = vsub.f32 %v258_v33, %v280_v51 }
 0x21d   :  { %v703_v53 = vpop.eup %514  ;;  %v303_v54 = vmul.f32 1.442695, %v293_v52 }
 0x21e   :  { %317 = vadd.xlane.f32.xlu0 %v703_v53 }
 0x21f   :  { %516 = vpow2.f32 %v303_v54 }
 0x222   :  { %v282_v55 = vpop.xlane.xlu1 %281 }
 0x223   :  { %v294_v56 = vsub.f32 %v261_v35, %v282_v55 }
 0x225   :  { %v706_v57 = vpop.eup %516  ;;  %v305_v58 = vmul.f32 1.442695, %v294_v56 }
 0x226   :  { %319 = vadd.xlane.f32.xlu1 %v706_v57 }
 0x227   :  { %518 = vpow2.f32 %v305_v58 }
 0x22a   :  { %v284_v59 = vpop.xlane.xlu2 %283 }
 0x22b   :  { %v295_v60 = vsub.f32 %v264_v37, %v284_v59 }
 0x22d   :  { %v709_v61 = vpop.eup %518  ;;  %v307_v62 = vmul.f32 1.442695, %v295_v60 }
 0x22e   :  { %321 = vadd.xlane.f32.xlu2 %v709_v61 }
 0x22f   :  { %520 = vpow2.f32 %v307_v62 }
 0x235   :  { %v712_v63 = vpop.eup %520 }
 0x236   :  { %323 = vadd.xlane.f32.xlu0 %v712_v63 }
 0x238   :  { %v286_v0 = vpop.xlane.xlu2 %285 }
 0x239   :  { %v296_v1 = vsub.f32 %v267_v39, %v286_v0 }
 0x23b   :  { %v309_v2 = vmul.f32 1.442695, %v296_v1 }
 0x23d   :  { %522 = vpow2.f32 %v309_v2 }
 0x240   :  { %v288_v3 = vpop.xlane.xlu0 %287 }
 0x241   :  { %v297_v4 = vsub.f32 %v270_v41, %v288_v3 }
 0x243   :  { %v715_v5 = vpop.eup %522  ;;  %v311_v6 = vmul.f32 1.442695, %v297_v4 }
 0x244   :  { %325 = vadd.xlane.f32.xlu1 %v715_v5 }
 0x245   :  { %524 = vpow2.f32 %v311_v6 }
 0x248   :  { %v290_v7 = vpop.xlane.xlu1 %289 }
 0x249   :  { %v298_v8 = vsub.f32 %v273_v43, %v290_v7 }
 0x24b   :  { %v718_v9 = vpop.eup %524  ;;  %v313_v10 = vmul.f32 1.442695, %v298_v8 }
 0x24c   :  { %327 = vadd.xlane.f32.xlu2 %v718_v9 }
 0x24d   :  { %526 = vpow2.f32 %v313_v10 }
 0x253   :  { %v721_v11 = vpop.eup %526 }
 0x254   :  { %329 = vadd.xlane.f32.xlu0 %v721_v11 }
 0x289   :  { %v316_v12 = vpop.xlane.xlu2 %315 }
 0x28a   :  { %528 = vrcp.f32 %v316_v12  ;;  %v342_v17 = vand.u32 2147483648, %v316_v12  ;;  %v340_v19 = vand.u32 2147483647, %v316_v12  ;;  %vm336_vm2 = vweird.f32 %v316_v12 }
 0x28c   :  { %v343_v22 = vor.u32 1.1754944e-38, %v342_v17  ;;  %vm341_vm4 = vcmp.eq.f32.partialorder %v340_v19, 8.507059e+37 }
 0x290   :  { %v529_v13 = vpop.eup %528 }
 0x291   :  { %v332_v14 = vmul.f32 %v529_v13, %v316_v12  ;;  %v318_v15 = vpop.xlane.xlu0 %317  ;;  %vm337_vm1 = vweird.f32 %v529_v13 }
 0x292   :  { %530 = vrcp.f32 %v318_v15  ;;  %vm338_vm3 = vmor %vm336_vm2, %vm337_vm1  ;;  %v356_v29 = vand.u32 2147483648, %v318_v15  ;;  %v354_v31 = vand.u32 2147483647, %v318_v15  ;;  %vm350_vm6 = vweird.f32 %v318_v15 }
 0x293   :  { %v333_v16 = vsub.f32 1.0, %v332_v14 }
 0x294   :  { %v357_v34 = vor.u32 1.1754944e-38, %v356_v29  ;;  %vm355_vm8 = vcmp.eq.f32.partialorder %v354_v31, 8.507059e+37 }
 0x295   :  { %v334_v18 = vmul.f32 %v529_v13, %v333_v16 }
 0x297   :  { %v335_v20 = vadd.f32 %v529_v13, %v334_v18 }
 0x298   :  { %v531_v21 = vpop.eup %530 }
 0x299   :  { %v339_v23 = vsel %vm338_vm3, %v529_v13, %v335_v20  ;;  %v346_v24 = vmul.f32 %v531_v21, %v318_v15  ;;  %v320_v25 = vpop.xlane.xlu1 %319  ;;  %vm351_vm5 = vweird.f32 %v531_v21 }
 0x29a   :  { %v344_v26 = vsel %vm341_vm4, %v343_v22, %v339_v23  ;;  %532 = vrcp.f32 %v320_v25  ;;  %vm352_vm7 = vmor %vm350_vm6, %vm351_vm5  ;;  %v370_v41 = vand.u32 2147483648, %v320_v25  ;;  %v368_v43 = vand.u32 2147483647, %v320_v25 }
 0x29b   :  { %v443_v27 = vmul.f32 %v700_v49, %v344_v26  ;;  %v347_v28 = vsub.f32 1.0, %v346_v24  ;;  %vm364_vm10 = vweird.f32 %v320_v25 }
 0x29c   :  { %v371_v46 = vor.u32 1.1754944e-38, %v370_v41  ;;  %vm369_vm12 = vcmp.eq.f32.partialorder %v368_v43, 8.507059e+37 }
 0x29d   :  { %451 = vst [vmem:[%s763_s7] sm:$0xff] %v443_v27  ;;  %v348_v30 = vmul.f32 %v531_v21, %v347_v28 }
 0x29f   :  { %v349_v32 = vadd.f32 %v531_v21, %v348_v30 }
 0x2a0   :  { %v533_v33 = vpop.eup %532 }
 0x2a1   :  { %v353_v35 = vsel %vm352_vm7, %v531_v21, %v349_v32  ;;  %v360_v36 = vmul.f32 %v533_v33, %v320_v25  ;;  %v322_v37 = vpop.xlane.xlu2 %321  ;;  %vm365_vm9 = vweird.f32 %v533_v33 }
 0x2a2   :  { %v358_v38 = vsel %vm355_vm8, %v357_v34, %v353_v35  ;;  %534 = vrcp.f32 %v322_v37  ;;  %vm366_vm11 = vmor %vm364_vm10, %vm365_vm9  ;;  %v382_v55 = vand.u32 2147483647, %v322_v37  ;;  %vm378_vm14 = vweird.f32 %v322_v37 }
 0x2a3   :  { %v444_v39 = vmul.f32 %v703_v53, %v358_v38  ;;  %v361_v40 = vsub.f32 1.0, %v360_v36  ;;  %v384_v53 = vand.u32 2147483648, %v322_v37 }
 0x2a4   :  { %vm383_vm0 = vcmp.eq.f32.partialorder %v382_v55, 8.507059e+37 }
 0x2a5   :  { %452 = vst [vmem:[%s763_s7 + $0x8] sm:$0xff] %v444_v39  ;;  %v362_v42 = vmul.f32 %v533_v33, %v361_v40  ;;  %v385_v59 = vor.u32 1.1754944e-38, %v384_v53 }
 0x2a7   :  { %v363_v44 = vadd.f32 %v533_v33, %v362_v42 }
 0x2a8   :  { %v535_v45 = vpop.eup %534 }
 0x2a9   :  { %v367_v47 = vsel %vm366_vm11, %v533_v33, %v363_v44  ;;  %v374_v48 = vmul.f32 %v535_v45, %v322_v37  ;;  %v324_v49 = vpop.xlane.xlu0 %323  ;;  %vm379_vm13 = vweird.f32 %v535_v45 }
 0x2aa   :  { %v372_v50 = vsel %vm369_vm12, %v371_v46, %v367_v47  ;;  %536 = vrcp.f32 %v324_v49  ;;  %vm380_vm15 = vmor %vm378_vm14, %vm379_vm13  ;;  %v398_v2 = vand.u32 2147483648, %v324_v49  ;;  %v396_v4 = vand.u32 2147483647, %v324_v49 }
 0x2ab   :  { %v445_v51 = vmul.f32 %v706_v57, %v372_v50  ;;  %v375_v52 = vsub.f32 1.0, %v374_v48  ;;  %vm392_vm2 = vweird.f32 %v324_v49 }
 0x2ac   :  { %v399_v8 = vor.u32 1.1754944e-38, %v398_v2  ;;  %vm397_vm4 = vcmp.eq.f32.partialorder %v396_v4, 8.507059e+37 }
 0x2ad   :  { %453 = vst [vmem:[%s763_s7 + $0x10] sm:$0xff] %v445_v51  ;;  %v376_v54 = vmul.f32 %v535_v45, %v375_v52 }
 0x2af   :  { %v377_v56 = vadd.f32 %v535_v45, %v376_v54 }
 0x2b0   :  { %v537_v58 = vpop.eup %536 }
 0x2b1   :  { %v381_v60 = vsel %vm380_vm15, %v535_v45, %v377_v56  ;;  %v388_v62 = vmul.f32 %v537_v58, %v324_v49  ;;  %vm393_vm1 = vweird.f32 %v537_v58 }
 0x2b2   :  { %v386_v0 = vsel %vm383_vm0, %v385_v59, %v381_v60  ;;  %vm394_vm3 = vmor %vm392_vm2, %vm393_vm1 }
 0x2b3   :  { %v446_v57 = vmul.f32 %v709_v61, %v386_v0  ;;  %v389_v1 = vsub.f32 1.0, %v388_v62 }
 0x2b5   :  { %454 = vst [vmem:[%s763_s7 + $0x18] sm:$0xff] %v446_v57  ;;  %v390_v3 = vmul.f32 %v537_v58, %v389_v1 }
 0x2b7   :  { %v391_v6 = vadd.f32 %v537_v58, %v390_v3  ;;  %v326_v7 = vpop.xlane.xlu1 %325 }
 0x2b8   :  { %538 = vrcp.f32 %v326_v7  ;;  %v412_v17 = vand.u32 2147483648, %v326_v7  ;;  %v410_v19 = vand.u32 2147483647, %v326_v7  ;;  %vm406_vm6 = vweird.f32 %v326_v7 }
 0x2b9   :  { %v395_v10 = vsel %vm394_vm3, %v537_v58, %v391_v6 }
 0x2ba   :  { %v400_v12 = vsel %vm397_vm4, %v399_v8, %v395_v10  ;;  %v413_v22 = vor.u32 1.1754944e-38, %v412_v17  ;;  %vm411_vm8 = vcmp.eq.f32.partialorder %v410_v19, 8.507059e+37 }
 0x2bb   :  { %v447_v61 = vmul.f32 %v712_v63, %v400_v12 }
 0x2bd   :  { %455 = vst [vmem:[%s763_s7 + $0x20] sm:$0xff] %v447_v61 }
 0x2be   :  { %v539_v13 = vpop.eup %538 }
 0x2bf   :  { %v402_v14 = vmul.f32 %v539_v13, %v326_v7  ;;  %v328_v15 = vpop.xlane.xlu2 %327  ;;  %vm407_vm5 = vweird.f32 %v539_v13 }
 0x2c0   :  { %540 = vrcp.f32 %v328_v15  ;;  %vm408_vm7 = vmor %vm406_vm6, %vm407_vm5  ;;  %v426_v28 = vand.u32 2147483648, %v328_v15  ;;  %v424_v30 = vand.u32 2147483647, %v328_v15  ;;  %vm420_vm10 = vweird.f32 %v328_v15 }
 0x2c1   :  { %v403_v16 = vsub.f32 1.0, %v402_v14 }
 0x2c2   :  { %v427_v33 = vor.u32 1.1754944e-38, %v426_v28  ;;  %vm425_vm12 = vcmp.eq.f32.partialorder %v424_v30, 8.507059e+37 }
 0x2c3   :  { %v404_v18 = vmul.f32 %v539_v13, %v403_v16 }
 0x2c5   :  { %v405_v20 = vadd.f32 %v539_v13, %v404_v18 }
 0x2c6   :  { %v541_v21 = vpop.eup %540 }
 0x2c7   :  { %v409_v23 = vsel %vm408_vm7, %v539_v13, %v405_v20  ;;  %v416_v63 = vmul.f32 %v541_v21, %v328_v15  ;;  %v330_v24 = vpop.xlane.xlu0 %329  ;;  %vm421_vm9 = vweird.f32 %v541_v21 }
 0x2c8   :  { %v414_v25 = vsel %vm411_vm8, %v413_v22, %v409_v23  ;;  %542 = vrcp.f32 %v330_v24  ;;  %vm422_vm11 = vmor %vm420_vm10, %vm421_vm9  ;;  %v440_v38 = vand.u32 2147483648, %v330_v24  ;;  %v438_v40 = vand.u32 2147483647, %v330_v24 }
 0x2c9   :  { %v448_v26 = vmul.f32 %v715_v5, %v414_v25  ;;  %v417_v27 = vsub.f32 1.0, %v416_v63  ;;  %vm434_vm14 = vweird.f32 %v330_v24 }
 0x2ca   :  { %v441_v42 = vor.u32 1.1754944e-38, %v440_v38  ;;  %vm439_vm0 = vcmp.eq.f32.partialorder %v438_v40, 8.507059e+37 }
 0x2cb   :  { %456 = vst [vmem:[%s763_s7 + $0x28] sm:$0xff] %v448_v26  ;;  %v418_v29 = vmul.f32 %v541_v21, %v417_v27 }
 0x2cd   :  { %v419_v31 = vadd.f32 %v541_v21, %v418_v29 }
 0x2ce   :  { %v543_v32 = vpop.eup %542 }
 0x2cf   :  { %v423_v34 = vsel %vm422_vm11, %v541_v21, %v419_v31  ;;  %v430_v35 = vmul.f32 %v543_v32, %v330_v24  ;;  %vm435_vm13 = vweird.f32 %v543_v32 }
 0x2d0   :  { %v428_v36 = vsel %vm425_vm12, %v427_v33, %v423_v34  ;;  %vm436_vm15 = vmor %vm434_vm14, %vm435_vm13 }
 0x2d1   :  { %v449_v5 = vmul.f32 %v718_v9, %v428_v36  ;;  %v431_v37 = vsub.f32 1.0, %v430_v35 }
 0x2d3   :  { %457 = vst [vmem:[%s763_s7 + $0x30] sm:$0xff] %v449_v5  ;;  %v432_v39 = vmul.f32 %v543_v32, %v431_v37 }
 0x2d5   :  { %v433_v41 = vadd.f32 %v543_v32, %v432_v39 }
 0x2d7   :  { %v437_v43 = vsel %vm436_vm15, %v543_v32, %v433_v41 }
 0x2d8   :  { %v442_v44 = vsel %vm439_vm0, %v441_v42, %v437_v43 }
 0x2d9   :  { %v450_v45 = vmul.f32 %v721_v11, %v442_v44 }
 0x2db   :  { %458 = vst [vmem:[%s763_s7 + $0x38] sm:$0xff] %v450_v45 }
 0x2dc   :  { %463 = vsyncpa [#allocation3], 1 }
 0x2dd   :  { %464 = vsyncpa [#allocation5], 1 }

</bundles_post_ra>
